<compile_context>
chip_gen: v7x
topology: tpu7x:2x2x1
jax: 0.10.0
libtpu: 0.0.40
codegen_flags: <defaults>
</compile_context>

<pallas_src>
import numpy as np
import jax
import jax.numpy as jnp
from jax.experimental import pallas as pl
from jax.experimental.pallas import tpu as pltpu

EPS = 1e-5  # torch BatchNorm1d default eps

# degree-11 odd minimax polynomial for atan(z), z in [-1, 1]  (max err ~2e-6 rad)
_AT_C1 = 0.99997726
_AT_C3 = -0.33262347
_AT_C5 = 0.19354346
_AT_C7 = -0.11643287
_AT_C9 = 0.05265332
_AT_C11 = -0.01172120


def _conv1d_same_band_matrix(w, T):
    """torch Conv1d(Cin->Cout, kernel=Tk, padding=(Tk-1)//2) on a length-T signal
    rewritten as   y_flat = x_flat @ M   (channel-major flattening).
    The conv bias is intentionally dropped: the training-mode BatchNorm that
    follows subtracts any per-channel constant exactly."""
    w = np.asarray(w, np.float32)
    Cout, Cin, Tk = w.shape
    pad = (Tk - 1) // 2
    M = np.zeros((Cin, T, Cout, T), dtype=np.float32)
    for t in range(T):
        for s in range(T):
            k = s - t + pad
            if 0 <= k < Tk:
                M[:, s, :, t] = w[:, :, k].T
    return M.reshape(Cin * T, Cout * T)


def build_encoder(input_channels, embedding_channels, time_range, key_range,
                  window, batch, key):
    Cin, E, T, N = input_channels, embedding_channels, time_range, batch
    Cmid = int(Cin / 3)
    K = np.fft.rfftfreq(T).shape[0] - 1          # spectrum bins with DC removed
    EK, CmT, ET = E * K, Cmid * T, E * T
    tpi = 2.0 * np.pi
    pi = np.pi

    def rup(x, m=8):
        return ((x + m - 1) // m) * m

    # -------- fused-consumer (WL) column layout, padded lane-dense to >=128 ----
    V_C = 2 * EK                  # per-channel fc outputs [x ch0..chE-1 | y ...]
    DC_C = 2 * EK + 2 * E         # DC term (already scaled by 1/T)
    WLW = rup(2 * EK + 3 * E, 128)
    assert ET <= 128 and 4 * E <= 128

    # -------- packed-output layout: [latent | pad | f | a | b | p | pad] -------
    OUT_W = 256
    F_C, A_C, B_C, P_C = 128, 128 + E, 128 + 2 * E, 128 + 3 * E

    # -------- deterministic synthetic parameters (torch layer shapes) ----------
    ks = jax.random.split(key, 12)

    def uni(k, shape, s):
        return np.asarray(jax.random.uniform(k, shape, jnp.float32, -s, s))

    w1 = uni(ks[0], (Cmid, Cin, T), 1.0 / np.sqrt(Cin * T))   # conv1.weight
    _b1 = uni(ks[1], (Cmid,),       1.0 / np.sqrt(Cin * T))   # conv1.bias (cancels under BN)
    w2 = uni(ks[2], (E, Cmid, T),   1.0 / np.sqrt(Cmid * T))  # conv2.weight
    _b2 = uni(ks[3], (E,),          1.0 / np.sqrt(Cmid * T))  # conv2.bias (cancels under BN)
    g1  = 1.0 + 0.1 * uni(ks[4], (Cmid,), 1.0)                # bn_conv1 gamma
    be1 = 0.1 * uni(ks[5], (Cmid,), 1.0)                      # bn_conv1 beta
    g2  = 1.0 + 0.1 * uni(ks[6], (E,), 1.0)                   # bn_conv2 gamma
    be2 = 0.1 * uni(ks[7], (E,), 1.0)                         # bn_conv2 beta
    wfc = uni(ks[8], (E, 2, T), 1.0 / np.sqrt(T))             # fc[i].weight (2, T)
    _bfc = uni(ks[9], (E, 2),   1.0 / np.sqrt(T))             # fc[i].bias (cancels under BN)
    gfc  = 1.0 + 0.1 * uni(ks[10], (E, 2), 1.0)               # bn[i] gamma
    befc = 0.1 * uni(ks[11], (E, 2), 1.0)                     # bn[i] beta
    # deconv1 / bn_deconv1 / deconv2 exist in __init__ but are unused by forward.

    # -------- precomputed glue matrices (plain numpy parameter setup) ----------
    W1 = _conv1d_same_band_matrix(w1, T)                      # (Cin*T, Cmid*T)
    W2 = _conv1d_same_band_matrix(w2, T)                      # (Cmid*T, E*T)
    S1 = np.kron(np.eye(Cmid, dtype=np.float32), np.ones((T, 1), np.float32))  # (CmT, Cmid)
    S2 = np.kron(np.eye(E, dtype=np.float32), np.ones((T, 1), np.float32))     # (ET, E)
    SK = np.kron(np.eye(E, dtype=np.float32), np.ones((K, 1), np.float32))     # (EK, E)

    # real DFT (torch.fft.rfft) bins 1..K as block-diagonal matmul matrices
    t_idx = np.arange(T)[:, None]
    k_idx = np.arange(1, K + 1)[None, :]
    ang = 2.0 * np.pi * t_idx * k_idx / T
    DCOS = np.kron(np.eye(E, dtype=np.float32), np.cos(ang).astype(np.float32))
    DSIN = np.kron(np.eye(E, dtype=np.float32), (-np.sin(ang)).astype(np.float32))

    # per-channel Linear(T, 2): column j*E + c holds output feature j of channel c
    WFC = np.zeros((ET, 2 * E), np.float32)
    for c in range(E):
        for j in range(2):
            WFC[c * T:(c + 1) * T, j * E + c] = wfc[c, j, :]

    # fused consumer weight for `lat`: [DCOS | DSIN | WFC | S2/T | 0-pad]
    WL = np.zeros((ET, WLW), np.float32)
    WL[:, 0:EK] = DCOS
    WL[:, EK:2 * EK] = DSIN
    WL[:, V_C:V_C + 2 * E] = WFC
    WL[:, DC_C:DC_C + E] = S2 * (1.0 / T)      # DC column prescaled -> b directly

    # spectral-sum matrix aligned 1:1 with z's columns (no re/im extraction);
    # columns prescaled by (2/T)^2 so a = sqrt(psum) directly.
    SK2 = np.zeros((WLW, E), np.float32)
    SK2[0:EK, :] = SK * (2.0 / T) ** 2
    SK2[EK:2 * EK, :] = SK * (2.0 / T) ** 2

    # 3-row affine / frequency pack, 8-lane-aligned segments
    G1_C = 0
    G2_C = rup(G1_C + Cmid)
    GFC_C = rup(G2_C + E)
    assert GFC_C + 2 * E <= WLW
    freqs_eff = (np.fft.rfftfreq(T)[1:] * T / window).astype(np.float32)  # freqs / time_scale
    ROWP = np.zeros((3, WLW), np.float32)
    ROWP[0, G1_C:G1_C + Cmid] = g1
    ROWP[1, G1_C:G1_C + Cmid] = be1
    ROWP[0, G2_C:G2_C + E] = g2
    ROWP[1, G2_C:G2_C + E] = be2
    ROWP[0, GFC_C:GFC_C + 2 * E] = gfc.T.reshape(-1)
    ROWP[1, GFC_C:GFC_C + 2 * E] = befc.T.reshape(-1)
    ROWP[2, 0:2 * EK] = np.tile(freqs_eff, 2 * E)             # 1/time_scale baked in

    # sublane-aligned pack of the BN selection / expansion matrices (all f32)
    S1_R = 0
    S1T_R = rup(S1_R + CmT)
    S2_R = rup(S1T_R + Cmid)
    S2T_R = rup(S2_R + ET)
    SEL_ROWS = rup(S2T_R + E)
    SEL_COLS = rup(max(CmT, ET))
    SELP = np.zeros((SEL_ROWS, SEL_COLS), np.float32)
    SELP[S1_R:S1_R + CmT, 0:Cmid] = S1
    SELP[S1T_R:S1T_R + Cmid, 0:CmT] = S1.T
    SELP[S2_R:S2_R + ET, 0:E] = S2
    SELP[S2T_R:S2T_R + E, 0:ET] = S2.T

    # constants baked into the kernel
    inv_cnt_ct = float(1.0 / (N * T))     # BatchNorm1d over (N, T) per channel
    inv_cnt_n = float(1.0 / N)            # BatchNorm1d over the batch (fc outputs)
    half_pi = float(0.5 * pi)
    inv_tpi = float(1.0 / tpi)

    def kernel(x_ref, w1_ref, w2_ref, wl_ref, sk2_ref, selp_ref, rowp_ref, out_ref):
        selp = selp_ref[...]
        rowp = rowp_ref[...]

        def conv_bn_tanh(inp_bf16, w_bf16, sel, selt, gamma, beta):
            # "same" Conv1d as a bf16 MXU matmul against a band matrix (f32 accum);
            # conv bias cancelled by the training-mode BatchNorm that follows.
            y = jnp.dot(inp_bf16, w_bf16, preferred_element_type=jnp.float32)
            stats = jnp.concatenate(
                [jnp.sum(y, axis=0, keepdims=True),
                 jnp.sum(y * y, axis=0, keepdims=True)], axis=0)          # (2, C*T) f32
            ch = jnp.dot(stats, sel, preferred_element_type=jnp.float32) * inv_cnt_ct
            mean = ch[0:1, :]
            var = jnp.maximum(ch[1:2, :] - mean * mean, 0.0)              # biased, clamped
            scale = gamma * jax.lax.rsqrt(var + EPS)
            shift = beta - mean * scale
            ssf = jnp.dot(jnp.concatenate([scale, shift], axis=0), selt,
                          preferred_element_type=jnp.float32)             # (2, C*T)
            return jnp.tanh(y * ssf[0:1, :] + ssf[1:2, :])

        x = x_ref[...].astype(jnp.bfloat16)
        h1 = conv_bn_tanh(x, w1_ref[...],
                          selp[S1_R:S1_R + CmT, 0:Cmid],
                          selp[S1T_R:S1T_R + Cmid, 0:CmT],
                          rowp[0:1, G1_C:G1_C + Cmid],
                          rowp[1:2, G1_C:G1_C + Cmid])
        lat = conv_bn_tanh(h1.astype(jnp.bfloat16), w2_ref[...],
                           selp[S2_R:S2_R + ET, 0:E],
                           selp[S2T_R:S2T_R + E, 0:ET],
                           rowp[0:1, G2_C:G2_C + E],
                           rowp[1:2, G2_C:G2_C + E])

        # ---- single fused matmul on `lat`: [DCOS | DSIN | WFC | S2/T | pad] ----
        z = jnp.dot(lat.astype(jnp.bfloat16), wl_ref[...],
                    preferred_element_type=jnp.float32)                   # (N, WLW)

        # spectral statistics: no re/im extraction, one stacked matmul
        z2 = z * z
        frq = rowp[2:3, :]                                                # (1, WLW)
        pf = jnp.dot(jnp.concatenate([z2, z2 * frq], axis=0), sk2_ref[...],
                     preferred_element_type=jnp.float32)                  # (2N, E)
        psum = pf[0:N, :]
        fnum = pf[N:2 * N, :]
        f = fnum * pl.reciprocal(psum + 1e-12, approx=True)               # 1/ts baked in frq
        a = jnp.sqrt(psum)                                                # (2/T)^2 baked in SK2
        b = z[:, DC_C:DC_C + E]                                           # 1/T baked in WL

        # ---- per-channel Linear(T, 2) + BatchNorm1d(2) (training-mode stats) ----
        v = z[:, V_C:V_C + 2 * E]
        vmean = jnp.sum(v, axis=0, keepdims=True) * inv_cnt_n
        vvar = jnp.maximum(jnp.sum(v * v, axis=0, keepdims=True) * inv_cnt_n
                           - vmean * vmean, 0.0)
        gfcr = rowp[0:1, GFC_C:GFC_C + 2 * E]
        befcr = rowp[1:2, GFC_C:GFC_C + 2 * E]
        vxy = (v - vmean) * (gfcr * jax.lax.rsqrt(vvar + EPS)) + befcr
        vx = vxy[:, 0:E]
        vy = vxy[:, E:2 * E]

        # ---- in-kernel atan2(vy, vx): atan(vy/vx) via odd minimax polynomial ----
        r = vy / vx
        ar = jnp.abs(r)
        use_inv = ar > 1.0
        zq = jnp.where(use_inv, 1.0 / ar, ar)                             # zq in [0, 1]
        zq2 = zq * zq
        poly = zq * (_AT_C1 + zq2 * (_AT_C3 + zq2 * (_AT_C5 + zq2 * (
            _AT_C7 + zq2 * (_AT_C9 + zq2 * _AT_C11)))))
        at = jnp.where(use_inv, half_pi - poly, poly)
        at = jnp.where(r < 0, -at, at)
        at = jnp.where((vx < 0) & (vy >= 0), at + pi, at)                 # + 0.5 * tpi
        at = jnp.where((vx < 0) & (vy < 0), at - pi, at)                  # - 0.5 * tpi
        p = at * inv_tpi

        # ---- single lane-dense store: [latent | pad | f | a | b | p | pad] ----
        out_ref[...] = jnp.concatenate(
            [lat, jnp.zeros((N, 128 - ET), jnp.float32),
             f, a, b, p, jnp.zeros((N, 128 - 4 * E), jnp.float32)], axis=1)

    params = (jnp.asarray(W1, jnp.bfloat16),     # bf16 MXU operands, f32 accumulation
              jnp.asarray(W2, jnp.bfloat16),
              jnp.asarray(WL, jnp.bfloat16),
              jnp.asarray(SK2, jnp.float32),     # tiny stats matmuls stay f32
              jnp.asarray(SELP, jnp.float32),
              jnp.asarray(ROWP, jnp.float32))

    # No grid: N=2 fits in one invocation; total VMEM footprint ~0.1 MiB, so no
    # vmem_limit override is needed.  (If batch grows, add a "parallel" grid
    # over row-tiles with parameter index_maps returning block 0.)
    call = pl.pallas_call(
        kernel,
        out_shape=jax.ShapeDtypeStruct((N, OUT_W), jnp.float32),
        in_specs=[pl.BlockSpec(memory_space=pltpu.MemorySpace.VMEM)
                  for _ in range(1 + len(params))],
        out_specs=pl.BlockSpec(memory_space=pltpu.MemorySpace.VMEM),
    )

    @jax.jit
    def forward(x):
        # x: (N, Cin, T) float32 — NCL, same as the PyTorch module input.
        x_flat = x.reshape(N, Cin * T)
        out = call(x_flat, *params)
        latent = out[:, 0:ET].reshape(N, E, T)
        f = out[:, F_C:F_C + E]
        a = out[:, A_C:A_C + E]
        b = out[:, B_C:B_C + E]
        p = out[:, P_C:P_C + E]
        return p[:, :, None], f[:, :, None], a[:, :, None], b[:, :, None], latent

    return forward


if __name__ == "__main__":
    input_channels = 9
    embedding_channels = 4
    time_range = 15            # odd -> "same" Conv1d preserves the length
    key_range = 30
    window = 2.0
    batch = 2

    key = jax.random.PRNGKey(0)
    k_param, k_x = jax.random.split(key)
    forward = build_encoder(input_channels, embedding_channels, time_range,
                            key_range, window, batch, k_param)

    x = jax.random.normal(k_x, (batch, input_channels, time_range), jnp.float32)
    p, f, a, b, latent = forward(x)
    jax.block_until_ready((p, f, a, b, latent))

    assert p.shape == (batch, embedding_channels, 1)
    assert f.shape == (batch, embedding_channels, 1)
    assert a.shape == (batch, embedding_channels, 1)
    assert b.shape == (batch, embedding_channels, 1)
    assert latent.shape == (batch, embedding_channels, time_range)
    assert all(bool(jnp.all(jnp.isfinite(t))) for t in (p, f, a, b, latent))
    print("KERNEL_OK")
</pallas_src>

<mosaic_0001>
module attributes {stable_mosaic.version = 11 : i64} {
  func.func @kernel(%arg0: memref<2x135xf32, #tpu.memory_space<vmem>>, %arg1: memref<135x45xbf16, #tpu.memory_space<vmem>>, %arg2: memref<45x60xbf16, #tpu.memory_space<vmem>>, %arg3: memref<60x128xbf16, #tpu.memory_space<vmem>>, %arg4: memref<128x4xf32, #tpu.memory_space<vmem>>, %arg5: memref<128x64xf32, #tpu.memory_space<vmem>>, %arg6: memref<3x128xf32, #tpu.memory_space<vmem>>, %arg7: memref<2x256xf32, #tpu.memory_space<vmem>>) attributes {dimension_semantics = [], scalar_prefetch = 0 : i64, scratch_operands = 0 : i64, tpu.core_type = #tpu.core_type<tc>} {
    %c0 = arith.constant 0 : index
    %c0_0 = arith.constant 0 : index
    %0 = vector.load %arg5[%c0, %c0_0] : memref<128x64xf32, #tpu.memory_space<vmem>>, vector<128x64xf32>
    %c0_1 = arith.constant 0 : index
    %c0_2 = arith.constant 0 : index
    %1 = vector.load %arg6[%c0_1, %c0_2] : memref<3x128xf32, #tpu.memory_space<vmem>>, vector<3x128xf32>
    %c0_3 = arith.constant 0 : index
    %c0_4 = arith.constant 0 : index
    %2 = vector.load %arg0[%c0_3, %c0_4] : memref<2x135xf32, #tpu.memory_space<vmem>>, vector<2x135xf32>
    %3 = arith.truncf %2 : vector<2x135xf32> to vector<2x135xbf16>
    %c0_5 = arith.constant 0 : index
    %c0_6 = arith.constant 0 : index
    %4 = vector.load %arg1[%c0_5, %c0_6] : memref<135x45xbf16, #tpu.memory_space<vmem>>, vector<135x45xbf16>
    %5 = vector.extract_strided_slice %0 {offsets = [0, 0], sizes = [45, 3], strides = [1, 1]} : vector<128x64xf32> to vector<45x3xf32>
    %6 = vector.extract_strided_slice %0 {offsets = [48, 0], sizes = [3, 45], strides = [1, 1]} : vector<128x64xf32> to vector<3x45xf32>
    %7 = vector.extract_strided_slice %1 {offsets = [0, 0], sizes = [1, 3], strides = [1, 1]} : vector<3x128xf32> to vector<1x3xf32>
    %8 = vector.extract_strided_slice %1 {offsets = [1, 0], sizes = [1, 3], strides = [1, 1]} : vector<3x128xf32> to vector<1x3xf32>
    %cst = arith.constant dense<0.000000e+00> : vector<2x45xf32>
    %9 = tpu.matmul %3, %4, %cst {dimension_numbers = #tpu.dot_dimension_numbers<[1], [0], [0], [1], [0, 0, 1, 1], [], []>} : vector<2x135xbf16>, vector<135x45xbf16>, vector<2x45xf32> -> vector<2x45xf32>
    %cst_7 = arith.constant dense<0.000000e+00> : vector<45xf32>
    %10 = vector.multi_reduction <add>, %9, %cst_7 [0] : vector<2x45xf32> to vector<45xf32>
    %11 = vector.shape_cast %10 : vector<45xf32> to vector<1x45xf32>
    %12 = arith.mulf %9, %9 : vector<2x45xf32>
    %cst_8 = arith.constant dense<0.000000e+00> : vector<45xf32>
    %13 = vector.multi_reduction <add>, %12, %cst_8 [0] : vector<2x45xf32> to vector<45xf32>
    %14 = vector.shape_cast %13 : vector<45xf32> to vector<1x45xf32>
    %15 = tpu.concatenate %11, %14 in 0 : vector<1x45xf32>, vector<1x45xf32> -> vector<2x45xf32>
    %cst_9 = arith.constant dense<0.000000e+00> : vector<2x3xf32>
    %16 = tpu.matmul %15, %5, %cst_9 {dimension_numbers = #tpu.dot_dimension_numbers<[1], [0], [0], [1], [0, 0, 1, 1], [], []>} : vector<2x45xf32>, vector<45x3xf32>, vector<2x3xf32> -> vector<2x3xf32>
    %cst_10 = arith.constant 0.0333333351 : f32
    %17 = vector.broadcast %cst_10 : f32 to vector<2x3xf32>
    %18 = arith.mulf %16, %17 : vector<2x3xf32>
    %19 = vector.extract_strided_slice %18 {offsets = [0, 0], sizes = [1, 3], strides = [1, 1]} : vector<2x3xf32> to vector<1x3xf32>
    %20 = vector.extract_strided_slice %18 {offsets = [1, 0], sizes = [1, 3], strides = [1, 1]} : vector<2x3xf32> to vector<1x3xf32>
    %21 = arith.mulf %19, %19 : vector<1x3xf32>
    %22 = arith.subf %20, %21 : vector<1x3xf32>
    %cst_11 = arith.constant 0.000000e+00 : f32
    %23 = vector.broadcast %cst_11 : f32 to vector<1x3xf32>
    %24 = arith.maximumf %22, %23 : vector<1x3xf32>
    %cst_12 = arith.constant 9.99999974E-6 : f32
    %25 = vector.broadcast %cst_12 : f32 to vector<1x3xf32>
    %26 = arith.addf %24, %25 : vector<1x3xf32>
    %27 = math.rsqrt %26 : vector<1x3xf32>
    %28 = arith.mulf %7, %27 : vector<1x3xf32>
    %29 = arith.mulf %19, %28 : vector<1x3xf32>
    %30 = arith.subf %8, %29 : vector<1x3xf32>
    %31 = tpu.concatenate %28, %30 in 0 : vector<1x3xf32>, vector<1x3xf32> -> vector<2x3xf32>
    %cst_13 = arith.constant dense<0.000000e+00> : vector<2x45xf32>
    %32 = tpu.matmul %31, %6, %cst_13 {dimension_numbers = #tpu.dot_dimension_numbers<[1], [0], [0], [1], [0, 0, 1, 1], [], []>} : vector<2x3xf32>, vector<3x45xf32>, vector<2x45xf32> -> vector<2x45xf32>
    %33 = vector.extract_strided_slice %32 {offsets = [0, 0], sizes = [1, 45], strides = [1, 1]} : vector<2x45xf32> to vector<1x45xf32>
    %34 = vector.broadcast %33 : vector<1x45xf32> to vector<2x45xf32>
    %35 = arith.mulf %9, %34 : vector<2x45xf32>
    %36 = vector.extract_strided_slice %32 {offsets = [1, 0], sizes = [1, 45], strides = [1, 1]} : vector<2x45xf32> to vector<1x45xf32>
    %37 = vector.broadcast %36 : vector<1x45xf32> to vector<2x45xf32>
    %38 = arith.addf %35, %37 : vector<2x45xf32>
    %39 = math.tanh %38 : vector<2x45xf32>
    %40 = arith.truncf %39 : vector<2x45xf32> to vector<2x45xbf16>
    %c0_14 = arith.constant 0 : index
    %c0_15 = arith.constant 0 : index
    %41 = vector.load %arg2[%c0_14, %c0_15] : memref<45x60xbf16, #tpu.memory_space<vmem>>, vector<45x60xbf16>
    %42 = vector.extract_strided_slice %0 {offsets = [56, 0], sizes = [60, 4], strides = [1, 1]} : vector<128x64xf32> to vector<60x4xf32>
    %43 = vector.extract_strided_slice %0 {offsets = [120, 0], sizes = [4, 60], strides = [1, 1]} : vector<128x64xf32> to vector<4x60xf32>
    %44 = vector.extract_strided_slice %1 {offsets = [0, 8], sizes = [1, 4], strides = [1, 1]} : vector<3x128xf32> to vector<1x4xf32>
    %45 = vector.extract_strided_slice %1 {offsets = [1, 8], sizes = [1, 4], strides = [1, 1]} : vector<3x128xf32> to vector<1x4xf32>
    %cst_16 = arith.constant dense<0.000000e+00> : vector<2x60xf32>
    %46 = tpu.matmul %40, %41, %cst_16 {dimension_numbers = #tpu.dot_dimension_numbers<[1], [0], [0], [1], [0, 0, 1, 1], [], []>} : vector<2x45xbf16>, vector<45x60xbf16>, vector<2x60xf32> -> vector<2x60xf32>
    %cst_17 = arith.constant dense<0.000000e+00> : vector<60xf32>
    %47 = vector.multi_reduction <add>, %46, %cst_17 [0] : vector<2x60xf32> to vector<60xf32>
    %48 = vector.shape_cast %47 : vector<60xf32> to vector<1x60xf32>
    %49 = arith.mulf %46, %46 : vector<2x60xf32>
    %cst_18 = arith.constant dense<0.000000e+00> : vector<60xf32>
    %50 = vector.multi_reduction <add>, %49, %cst_18 [0] : vector<2x60xf32> to vector<60xf32>
    %51 = vector.shape_cast %50 : vector<60xf32> to vector<1x60xf32>
    %52 = tpu.concatenate %48, %51 in 0 : vector<1x60xf32>, vector<1x60xf32> -> vector<2x60xf32>
    %cst_19 = arith.constant dense<0.000000e+00> : vector<2x4xf32>
    %53 = tpu.matmul %52, %42, %cst_19 {dimension_numbers = #tpu.dot_dimension_numbers<[1], [0], [0], [1], [0, 0, 1, 1], [], []>} : vector<2x60xf32>, vector<60x4xf32>, vector<2x4xf32> -> vector<2x4xf32>
    %cst_20 = arith.constant 0.0333333351 : f32
    %54 = vector.broadcast %cst_20 : f32 to vector<2x4xf32>
    %55 = arith.mulf %53, %54 : vector<2x4xf32>
    %56 = vector.extract_strided_slice %55 {offsets = [0, 0], sizes = [1, 4], strides = [1, 1]} : vector<2x4xf32> to vector<1x4xf32>
    %57 = vector.extract_strided_slice %55 {offsets = [1, 0], sizes = [1, 4], strides = [1, 1]} : vector<2x4xf32> to vector<1x4xf32>
    %58 = arith.mulf %56, %56 : vector<1x4xf32>
    %59 = arith.subf %57, %58 : vector<1x4xf32>
    %cst_21 = arith.constant 0.000000e+00 : f32
    %60 = vector.broadcast %cst_21 : f32 to vector<1x4xf32>
    %61 = arith.maximumf %59, %60 : vector<1x4xf32>
    %cst_22 = arith.constant 9.99999974E-6 : f32
    %62 = vector.broadcast %cst_22 : f32 to vector<1x4xf32>
    %63 = arith.addf %61, %62 : vector<1x4xf32>
    %64 = math.rsqrt %63 : vector<1x4xf32>
    %65 = arith.mulf %44, %64 : vector<1x4xf32>
    %66 = arith.mulf %56, %65 : vector<1x4xf32>
    %67 = arith.subf %45, %66 : vector<1x4xf32>
    %68 = tpu.concatenate %65, %67 in 0 : vector<1x4xf32>, vector<1x4xf32> -> vector<2x4xf32>
    %cst_23 = arith.constant dense<0.000000e+00> : vector<2x60xf32>
    %69 = tpu.matmul %68, %43, %cst_23 {dimension_numbers = #tpu.dot_dimension_numbers<[1], [0], [0], [1], [0, 0, 1, 1], [], []>} : vector<2x4xf32>, vector<4x60xf32>, vector<2x60xf32> -> vector<2x60xf32>
    %70 = vector.extract_strided_slice %69 {offsets = [0, 0], sizes = [1, 60], strides = [1, 1]} : vector<2x60xf32> to vector<1x60xf32>
    %71 = vector.broadcast %70 : vector<1x60xf32> to vector<2x60xf32>
    %72 = arith.mulf %46, %71 : vector<2x60xf32>
    %73 = vector.extract_strided_slice %69 {offsets = [1, 0], sizes = [1, 60], strides = [1, 1]} : vector<2x60xf32> to vector<1x60xf32>
    %74 = vector.broadcast %73 : vector<1x60xf32> to vector<2x60xf32>
    %75 = arith.addf %72, %74 : vector<2x60xf32>
    %76 = math.tanh %75 : vector<2x60xf32>
    %77 = arith.truncf %76 : vector<2x60xf32> to vector<2x60xbf16>
    %c0_24 = arith.constant 0 : index
    %c0_25 = arith.constant 0 : index
    %78 = vector.load %arg3[%c0_24, %c0_25] : memref<60x128xbf16, #tpu.memory_space<vmem>>, vector<60x128xbf16>
    %cst_26 = arith.constant dense<0.000000e+00> : vector<2x128xf32>
    %79 = tpu.matmul %77, %78, %cst_26 {dimension_numbers = #tpu.dot_dimension_numbers<[1], [0], [0], [1], [0, 0, 1, 1], [], []>} : vector<2x60xbf16>, vector<60x128xbf16>, vector<2x128xf32> -> vector<2x128xf32>
    %80 = arith.mulf %79, %79 : vector<2x128xf32>
    %81 = vector.extract_strided_slice %1 {offsets = [2, 0], sizes = [1, 128], strides = [1, 1]} : vector<3x128xf32> to vector<1x128xf32>
    %82 = vector.broadcast %81 : vector<1x128xf32> to vector<2x128xf32>
    %83 = arith.mulf %80, %82 : vector<2x128xf32>
    %84 = tpu.concatenate %80, %83 in 0 : vector<2x128xf32>, vector<2x128xf32> -> vector<4x128xf32>
    %c0_27 = arith.constant 0 : index
    %c0_28 = arith.constant 0 : index
    %85 = vector.load %arg4[%c0_27, %c0_28] : memref<128x4xf32, #tpu.memory_space<vmem>>, vector<128x4xf32>
    %cst_29 = arith.constant dense<0.000000e+00> : vector<4x4xf32>
    %86 = tpu.matmul %84, %85, %cst_29 {dimension_numbers = #tpu.dot_dimension_numbers<[1], [0], [0], [1], [0, 0, 1, 1], [], []>} : vector<4x128xf32>, vector<128x4xf32>, vector<4x4xf32> -> vector<4x4xf32>
    %87 = vector.extract_strided_slice %86 {offsets = [0, 0], sizes = [2, 4], strides = [1, 1]} : vector<4x4xf32> to vector<2x4xf32>
    %88 = vector.extract_strided_slice %86 {offsets = [2, 0], sizes = [2, 4], strides = [1, 1]} : vector<4x4xf32> to vector<2x4xf32>
    %cst_30 = arith.constant 9.99999996E-13 : f32
    %89 = vector.broadcast %cst_30 : f32 to vector<2x4xf32>
    %90 = arith.addf %87, %89 : vector<2x4xf32>
    %91 = tpu.reciprocal %90 {approx = true} : vector<2x4xf32> -> vector<2x4xf32>
    %92 = arith.mulf %88, %91 : vector<2x4xf32>
    %93 = math.sqrt %87 : vector<2x4xf32>
    %94 = vector.extract_strided_slice %79 {offsets = [0, 64], sizes = [2, 4], strides = [1, 1]} : vector<2x128xf32> to vector<2x4xf32>
    %95 = vector.extract_strided_slice %79 {offsets = [0, 56], sizes = [2, 8], strides = [1, 1]} : vector<2x128xf32> to vector<2x8xf32>
    %cst_31 = arith.constant dense<0.000000e+00> : vector<8xf32>
    %96 = vector.multi_reduction <add>, %95, %cst_31 [0] : vector<2x8xf32> to vector<8xf32>
    %97 = vector.shape_cast %96 : vector<8xf32> to vector<1x8xf32>
    %cst_32 = arith.constant 5.000000e-01 : f32
    %98 = vector.broadcast %cst_32 : f32 to vector<1x8xf32>
    %99 = arith.mulf %97, %98 : vector<1x8xf32>
    %100 = arith.mulf %95, %95 : vector<2x8xf32>
    %cst_33 = arith.constant dense<0.000000e+00> : vector<8xf32>
    %101 = vector.multi_reduction <add>, %100, %cst_33 [0] : vector<2x8xf32> to vector<8xf32>
    %102 = vector.shape_cast %101 : vector<8xf32> to vector<1x8xf32>
    %cst_34 = arith.constant 5.000000e-01 : f32
    %103 = vector.broadcast %cst_34 : f32 to vector<1x8xf32>
    %104 = arith.mulf %102, %103 : vector<1x8xf32>
    %105 = arith.mulf %99, %99 : vector<1x8xf32>
    %106 = arith.subf %104, %105 : vector<1x8xf32>
    %cst_35 = arith.constant 0.000000e+00 : f32
    %107 = vector.broadcast %cst_35 : f32 to vector<1x8xf32>
    %108 = arith.maximumf %106, %107 : vector<1x8xf32>
    %109 = vector.extract_strided_slice %1 {offsets = [0, 16], sizes = [1, 8], strides = [1, 1]} : vector<3x128xf32> to vector<1x8xf32>
    %110 = vector.extract_strided_slice %1 {offsets = [1, 16], sizes = [1, 8], strides = [1, 1]} : vector<3x128xf32> to vector<1x8xf32>
    %111 = vector.broadcast %99 : vector<1x8xf32> to vector<2x8xf32>
    %112 = arith.subf %95, %111 : vector<2x8xf32>
    %cst_36 = arith.constant 9.99999974E-6 : f32
    %113 = vector.broadcast %cst_36 : f32 to vector<1x8xf32>
    %114 = arith.addf %108, %113 : vector<1x8xf32>
    %115 = math.rsqrt %114 : vector<1x8xf32>
    %116 = arith.mulf %109, %115 : vector<1x8xf32>
    %117 = vector.broadcast %116 : vector<1x8xf32> to vector<2x8xf32>
    %118 = arith.mulf %112, %117 : vector<2x8xf32>
    %119 = vector.broadcast %110 : vector<1x8xf32> to vector<2x8xf32>
    %120 = arith.addf %118, %119 : vector<2x8xf32>
    %121 = vector.extract_strided_slice %120 {offsets = [0, 0], sizes = [2, 4], strides = [1, 1]} : vector<2x8xf32> to vector<2x4xf32>
    %122 = vector.extract_strided_slice %120 {offsets = [0, 4], sizes = [2, 4], strides = [1, 1]} : vector<2x8xf32> to vector<2x4xf32>
    %123 = arith.divf %122, %121 : vector<2x4xf32>
    %124 = math.absf %123 : vector<2x4xf32>
    %cst_37 = arith.constant 1.000000e+00 : f32
    %125 = vector.broadcast %cst_37 : f32 to vector<2x4xf32>
    %126 = arith.cmpf ogt, %124, %125 : vector<2x4xf32>
    %cst_38 = arith.constant 1.000000e+00 : f32
    %127 = vector.broadcast %cst_38 : f32 to vector<2x4xf32>
    %128 = arith.divf %127, %124 : vector<2x4xf32>
    %129 = arith.select %126, %128, %124 : vector<2x4xi1>, vector<2x4xf32>
    %130 = arith.mulf %129, %129 : vector<2x4xf32>
    %cst_39 = arith.constant -1.172120e-02 : f32
    %131 = vector.broadcast %cst_39 : f32 to vector<2x4xf32>
    %132 = arith.mulf %130, %131 : vector<2x4xf32>
    %cst_40 = arith.constant 0.0526533201 : f32
    %133 = vector.broadcast %cst_40 : f32 to vector<2x4xf32>
    %134 = arith.addf %133, %132 : vector<2x4xf32>
    %135 = arith.mulf %130, %134 : vector<2x4xf32>
    %cst_41 = arith.constant -0.116432868 : f32
    %136 = vector.broadcast %cst_41 : f32 to vector<2x4xf32>
    %137 = arith.addf %136, %135 : vector<2x4xf32>
    %138 = arith.mulf %130, %137 : vector<2x4xf32>
    %cst_42 = arith.constant 0.193543464 : f32
    %139 = vector.broadcast %cst_42 : f32 to vector<2x4xf32>
    %140 = arith.addf %139, %138 : vector<2x4xf32>
    %141 = arith.mulf %130, %140 : vector<2x4xf32>
    %cst_43 = arith.constant -0.332623482 : f32
    %142 = vector.broadcast %cst_43 : f32 to vector<2x4xf32>
    %143 = arith.addf %142, %141 : vector<2x4xf32>
    %144 = arith.mulf %130, %143 : vector<2x4xf32>
    %cst_44 = arith.constant 0.999977231 : f32
    %145 = vector.broadcast %cst_44 : f32 to vector<2x4xf32>
    %146 = arith.addf %145, %144 : vector<2x4xf32>
    %147 = arith.mulf %129, %146 : vector<2x4xf32>
    %cst_45 = arith.constant 1.57079637 : f32
    %148 = vector.broadcast %cst_45 : f32 to vector<2x4xf32>
    %149 = arith.subf %148, %147 : vector<2x4xf32>
    %150 = arith.select %126, %149, %147 : vector<2x4xi1>, vector<2x4xf32>
    %cst_46 = arith.constant 0.000000e+00 : f32
    %151 = vector.broadcast %cst_46 : f32 to vector<2x4xf32>
    %152 = arith.cmpf olt, %123, %151 : vector<2x4xf32>
    %cst_47 = arith.constant 0.000000e+00 : f32
    %153 = vector.broadcast %cst_47 : f32 to vector<2x4xf32>
    %154 = arith.subf %153, %150 : vector<2x4xf32>
    %155 = arith.select %152, %154, %150 : vector<2x4xi1>, vector<2x4xf32>
    %cst_48 = arith.constant 0.000000e+00 : f32
    %156 = vector.broadcast %cst_48 : f32 to vector<2x4xf32>
    %157 = arith.cmpf olt, %121, %156 : vector<2x4xf32>
    %cst_49 = arith.constant 0.000000e+00 : f32
    %158 = vector.broadcast %cst_49 : f32 to vector<2x4xf32>
    %159 = arith.cmpf oge, %122, %158 : vector<2x4xf32>
    %160 = arith.andi %157, %159 : vector<2x4xi1>
    %cst_50 = arith.constant 3.14159274 : f32
    %161 = vector.broadcast %cst_50 : f32 to vector<2x4xf32>
    %162 = arith.addf %155, %161 : vector<2x4xf32>
    %163 = arith.select %160, %162, %155 : vector<2x4xi1>, vector<2x4xf32>
    %cst_51 = arith.constant 0.000000e+00 : f32
    %164 = vector.broadcast %cst_51 : f32 to vector<2x4xf32>
    %165 = arith.cmpf olt, %121, %164 : vector<2x4xf32>
    %cst_52 = arith.constant 0.000000e+00 : f32
    %166 = vector.broadcast %cst_52 : f32 to vector<2x4xf32>
    %167 = arith.cmpf olt, %122, %166 : vector<2x4xf32>
    %168 = arith.andi %165, %167 : vector<2x4xi1>
    %cst_53 = arith.constant 3.14159274 : f32
    %169 = vector.broadcast %cst_53 : f32 to vector<2x4xf32>
    %170 = arith.subf %163, %169 : vector<2x4xf32>
    %171 = arith.select %168, %170, %163 : vector<2x4xi1>, vector<2x4xf32>
    %cst_54 = arith.constant 0.159154937 : f32
    %172 = vector.broadcast %cst_54 : f32 to vector<2x4xf32>
    %173 = arith.mulf %171, %172 : vector<2x4xf32>
    %cst_55 = arith.constant 0.000000e+00 : f32
    %174 = vector.broadcast %cst_55 : f32 to vector<2x68xf32>
    %cst_56 = arith.constant 0.000000e+00 : f32
    %175 = vector.broadcast %cst_56 : f32 to vector<2x112xf32>
    %176 = tpu.concatenate %76, %174, %92, %93, %94, %173, %175 in 1 : vector<2x60xf32>, vector<2x68xf32>, vector<2x4xf32>, vector<2x4xf32>, vector<2x4xf32>, vector<2x4xf32>, vector<2x112xf32> -> vector<2x256xf32>
    %c0_57 = arith.constant 0 : index
    %c0_58 = arith.constant 0 : index
    %177 = vector.load %arg7[%c0_57, %c0_58] : memref<2x256xf32, #tpu.memory_space<vmem>>, vector<2x256xf32>
    tpu.vector_store %arg7[%c0_57, %c0_58], %176 {strides = array<i32>} : memref<2x256xf32, #tpu.memory_space<vmem>>, vector<2x256xf32>,
    return
  }
}

</mosaic_0001>

<bundles_post_ra>
// kernel: forward.1
= control target key start
LH: loop header
LB: loop body
LE: loop exit
PB: predicated region body
PF: predicated region fallthrough
CT: control target
= control target key end

     0   :  { %12 = vsyncpa [#allocation3], 0  ;;  %s1670_s0 = inlined_call_operand.vmem [shape: f32[2,135], index: 0, kind: input, shape index: {}]   ;;  %s1671_s1 = inlined_call_operand.vmem [shape: bf16[135,45], index: 1, kind: input, shape index: {}]   ;;  %s1672_s2 = inlined_call_operand.vmem [shape: bf16[45,60], index: 2, kind: input, shape index: {}]   ;;  %s1673_s3 = inlined_call_operand.hbm [shape: bf16[60,128], index: 3, kind: input, shape index: {}]   ;;  %s1674_s4 = inlined_call_operand.hbm [shape: f32[128,4], index: 4, kind: input, shape index: {}]   ;;  %s1675_s5 = inlined_call_operand.hbm [shape: f32[128,64], index: 5, kind: input, shape index: {}]   ;;  %s1676_s6 = inlined_call_operand.vmem [shape: f32[3,128], index: 6, kind: input, shape index: {}]   ;;  %s1677_s7 = inlined_call_operand.vmem [shape: f32[2,256], index: 7, kind: output, shape index: {}]  }
   0x1   :  { %13 = vsyncpa [#allocation5], 0  ;;  %s1381_s24 = smov [#allocation4]   ;;  %s1311_s28 = scalar_lea.hbm %s1674_s4, 2048 }
   0x2   :  { %s37_s25 = sshll.u32 %s1381_s24, 4  ;;  %p1312_p0 = scmp.ne.s32.totalorder %s1674_s4, %s1311_s28  ;;  %s38_s25 = int_to_ptr.vmem [resolvable:$true] %s37_s25 }
   0x3   :  { %p1315_p1 = scmp.lt.u32.totalorder %s1311_s28, %s1674_s4 }
   0x5   :  { %p1317_p2 = pnand %p1315_p1, %p1312_p0 }
   0x7   :  { %1320 = shalt.err (!%p1317_p2)
}
   0x8   :  { %s1321_s10 = scalar_lea.vmem %s38_s25, 2048  ;;  %p1326_p4 = scmp.lt.s32.totalorder %s38_s25, %s38_s25 }
   0x9   :  { %p1322_p3 = scmp.ne.s32.totalorder %s38_s25, %s1321_s10  ;;  %p1327_p5 = scmp.lt.s32.totalorder %s1321_s10, %s1321_s10 }
   0xb   :  { %p1328_p6 = por %p1327_p5, %p1326_p4 }
   0xd   :  { %p1329_p7 = pnand %p1328_p6, %p1322_p3 }
   0xf   :  { %1332 = shalt.err (!%p1329_p7)
}
  0x10   :  { %s1382_s11 = smov 128   ;;  %s1383_s12 = smov 8  }
  0x11   :  { %43 = dma.hbm_to_vmem [thread:$0]  %s1674_s4, 2048, %s38_s25, [#allocation5], %s1382_s11, %s1382_s11, %s1383_s12  }
  0x12   :  { %s1384_s15 = smov [#allocation2]   ;;  %s1333_s19 = scalar_lea.hbm %s1673_s3, 512 }
  0x13   :  { %s25_s16 = sshll.u32 %s1384_s15, 4  ;;  %p1334_p8 = scmp.ne.s32.totalorder %s1673_s3, %s1333_s19  ;;  %s26_s16 = int_to_ptr.vmem [resolvable:$true] %s25_s16 }
  0x14   :  { %p1337_p9 = scmp.lt.u32.totalorder %s1333_s19, %s1673_s3 }
  0x16   :  { %p1339_p10 = pnand %p1337_p9, %p1334_p8 }
  0x18   :  { %1342 = shalt.err (!%p1339_p10)
}
  0x19   :  { %s1343_s24 = scalar_lea.vmem %s26_s16, 512  ;;  %p1348_p12 = scmp.lt.s32.totalorder %s26_s16, %s26_s16 }
  0x1a   :  { %p1344_p11 = scmp.ne.s32.totalorder %s26_s16, %s1343_s24  ;;  %p1349_p13 = scmp.lt.s32.totalorder %s1343_s24, %s1343_s24 }
  0x1c   :  { %p1350_p0 = por %p1349_p13, %p1348_p12 }
  0x1e   :  { %p1351_p1 = pnand %p1350_p0, %p1344_p11 }
  0x20   :  { %1354 = shalt.err (!%p1351_p1)
}
  0x21   :  { %s1385_s4 = smov 64   ;;  %s1386_s25 = smov 4  }
  0x22   :  { %31 = dma.hbm_to_vmem [thread:$0]  %s1673_s3, 512, %s26_s16, [#allocation3], %s1385_s4, %s1385_s4, %s1386_s25  }
  0x23   :  { %s1387_s28 = smov [#allocation6]   ;;  %s1355_s9 = scalar_lea.hbm %s1675_s5, 2048 }
  0x24   :  { %s49_s29 = sshll.u32 %s1387_s28, 4  ;;  %p1356_p2 = scmp.ne.s32.totalorder %s1675_s5, %s1355_s9  ;;  %s50_s29 = int_to_ptr.vmem [resolvable:$true] %s49_s29 }
  0x25   :  { %p1359_p3 = scmp.lt.u32.totalorder %s1355_s9, %s1675_s5 }
  0x27   :  { %p1361_p4 = pnand %p1359_p3, %p1356_p2 }
  0x29   :  { %1364 = shalt.err (!%p1361_p4)
}
  0x2a   :  { %s1365_s17 = scalar_lea.vmem %s50_s29, 2048  ;;  %p1370_p6 = scmp.lt.s32.totalorder %s50_s29, %s50_s29 }
  0x2b   :  { %p1366_p5 = scmp.ne.s32.totalorder %s50_s29, %s1365_s17  ;;  %p1371_p7 = scmp.lt.s32.totalorder %s1365_s17, %s1365_s17 }
  0x2d   :  { %p1372_p8 = por %p1371_p7, %p1370_p6 }
  0x2f   :  { %p1373_p9 = pnand %p1372_p8, %p1366_p5 }
  0x31   :  { %1376 = shalt.err (!%p1373_p9)
}
  0x32   :  { %55 = dma.hbm_to_vmem [thread:$0]  %s1675_s5, 2048, %s50_s29, [#allocation5], %s1382_s11, %s1382_s11, %s1383_s12  }
  0x33   :  { %1377 = dma.done.wait [#allocation3], 512  }
  0x34   :  { %1378 = vsyncadd [#allocation3], 4294966784 }
  0x35   :  { %1379 = dma.done.wait [#allocation5], 4096  }
  0x36   :  { %1380 = vsyncadd [#allocation5], 4294963200  ;;  %v1388_v0 = vmov 0   ;;  %v1277_v1 = vld [vmem:[%s1671_s1] sm:$0xff]   ;;  %v1278_v2 = vld [vmem:[%s1671_s1 + $0x8] sm:$0xff]   ;;  %vm167_vm0 = vcmask 56320  }
  0x37   :  { %178 = vmatprep.subr.bf16.mxu0 %v1388_v0  ;;  %v1279_v3 = vld [vmem:[%s1671_s1 + $0x10] sm:$0xff]   ;;  %v1280_v4 = vld [vmem:[%s1671_s1 + $0x18] sm:$0xff]   ;;  %v1034_v5 = vld.sshfl [vmem:[%s1670_s0] sm:$0x33 pattern:$0x76325410] }
  0x38   :  { %179 = vmatpush1.bf16.msra.mxu0 %v1277_v1  ;;  %v94_v6 = vcombine.high %v1034_v5, %v1034_v5  ;;  %v1281_v8 = vld [vmem:[%s1671_s1 + $0x20] sm:$0xff]   ;;  %v1282_v9 = vld [vmem:[%s1671_s1 + $0x28] sm:$0xff]   ;;  %vm171_vm1 = vcmask 1042432   ;;  %v1283_v10 = vld [vmem:[%s1671_s1 + $0x30] sm:$0xff]   ;;  %vm172_vm2 = vcmask 1043456   ;;  %v1389_v11 = vmov 65535  }
  0x39   :  { %180 = vmatprep.subr.bf16.mxu0 %v1388_v0  ;;  %v173_v12 = vsel %vm171_vm1, 4294967295, %v1389_v11  ;;  %v1284_v13 = vld [vmem:[%s1671_s1 + $0x38] sm:$0xff]   ;;  %v1285_v14 = vld [vmem:[%s1671_s1 + $0x40] ss:$0 sps:$4 sm:$0xff]   ;;  %v97_v17 = vpack.c.bf16 %v1034_v5, %v1034_v5  ;;  %v69_v19 = vld [vmem:[#allocation6 + $0x8] sm:$0xff]  ;;  %v1390_v21 = vmov 0.0|0.0  }
  0x3a   :  { %v98_v7 = vpack.c.bf16 %v94_v6, %v94_v6  ;;  %v174_v15 = vsel %vm172_vm2, %v173_v12, 0  ;;  %v68_v18 = vld [vmem:[#allocation6] sm:$0xff]  ;;  %v70_v22 = vld [vmem:[#allocation6 + $0x10] sm:$0xff]  ;;  %v71_v23 = vld [vmem:[#allocation6 + $0x18] sm:$0xff]  ;;  %vm240_vm3 = vcmask 1044480   ;;  %vm1391_vm4 = vmmov 1  }
  0x3b   :  { %v176_v16 = vand.u32 %v1285_v14, %v174_v15  ;;  %v1212_v20 = vpack.c.bf16 %v69_v19, %v68_v18  ;;  %v1215_v24 = vpack.c.bf16 %v71_v23, %v70_v22  ;;  %v72_v25 = vld [vmem:[#allocation6 + $0x20] sm:$0xff]  ;;  %v73_v26 = vld [vmem:[#allocation6 + $0x28] sm:$0xff]  ;;  %vm1219_vm5 = vmpackc.low %vm240_vm3, %vm1391_vm4  ;;  %vm1392_vm6 = vmmov 0   ;;  %s1396_s19 = smov 40   ;;  %s1397_s20 = smov 124  }
  0x3c   :  { %181 = vmatpush1.bf16.msra.mxu0 %v1278_v2  ;;  %1044 = vmatprep.mubr.msk.bf16.mxu0 %vm167_vm0, %v98_v7  ;;  %v1218_v27 = vpack.c.bf16 %v73_v26, %v72_v25  ;;  %v1393_v28 = vmov 0.0   ;;  %vm218_vm7 = vcmask 361472   ;;  %vm234_vm8 = vcmask 1040384   ;;  %v74_v49 = vld [vmem:[#allocation6 + $0x30] sm:$0xff]  ;;  %v1549_v59 = vld [vmem:[%s1676_s6] sm:$0x7]  ;;  %vm1232_vm13 = vmpackc.low %vm172_vm2, %vm1391_vm4 }
  0x3d   :  { %182 = vmatprep.subr.bf16.mxu0 %v1388_v0  ;;  %1125 = vmatprep.subr.mxu1 %v1393_v28  ;;  %vm236_vm9 = vcmask 367616   ;;  %vm333_vm10 = vcmask 23552   ;;  %vm448_vm11 = vcmask 1045504   ;;  %v1287_v5 = vld [vmem:[%s1672_s2 + $0x8] sm:$0xff]   ;;  %v1288_v6 = vld [vmem:[%s1672_s2 + $0x10] sm:$0x7f]  }
  0x3e   :  { %1127 = vmatprep.mubr.msk.f32.mxu1 %vm1392_vm6, %v1393_v28  ;;  %1126 = vmatpush3.msk.msra.mxu1 %vm171_vm1, %v74_v49  ;;  %vm449_vm12 = vcmask 1046528   ;;  %v75_v22 = vld [vmem:[#allocation6 + $0x38] sm:$0xff]  ;;  %v76_v23 = vld [vmem:[#allocation6 + $0x40] sm:$0xff]  ;;  %v77_v25 = vld [vmem:[#allocation6 + $0x48] sm:$0xff]  ;;  %vm495_vm14 = vcmask 484352   ;;  %vm512_vm15 = vcmask 490496  }
  0x3f   :  { %1130 = vmatprep.subr.bf16.mxu1 %v1393_v28  ;;  %v78_v26 = vld [vmem:[#allocation6 + $0x50] sm:$0xff]  ;;  %vm619_vm0 = vcmask 31744   ;;  %vm894_vm1 = vcmask 517568   ;;  %s1398_s21 = smov 72  }
  0x40   :  { %183 = vmatpush1.bf16.msra.mxu0 %v1279_v3  ;;  %v1286_v3 = vld [vmem:[%s1672_s2] sm:$0xff]   ;;  %s1394_s2 = smov 120  }
  0x41   :  { %184 = vmatprep.subr.bf16.mxu0 %v1388_v0 }
  0x44   :  { %185 = vmatpush1.bf16.msra.mxu0 %v1280_v4  ;;  %v450_v4 = vsel %vm448_vm11, 4294967295, %v1389_v11 }
  0x45   :  { %186 = vmatprep.subr.bf16.mxu0 %v1388_v0  ;;  %v451_v7 = vsel %vm449_vm12, %v450_v4, 0 }
  0x48   :  { %187 = vmatpush1.bf16.msra.mxu0 %v1281_v8  ;;  %v453_v8 = vand.u32 %v1288_v6, %v451_v7 }
  0x49   :  { %188 = vmatprep.subr.bf16.mxu0 %v1388_v0 }
  0x4c   :  { %189 = vmatpush1.bf16.msra.mxu0 %v1282_v9  ;;  %v410_v9 = vlaneseq }
  0x4d   :  { %190 = vmatprep.subr.bf16.mxu0 %v1388_v0 }
  0x50   :  { %191 = vmatpush1.bf16.msra.mxu0 %v1283_v10  ;;  %v1570_v10 = vshrl.u32 %v410_v9, 7 }
  0x51   :  { %192 = vmatprep.subr.bf16.mxu0 %v1388_v0 }
  0x52   :  { %v1573_v11 = vsub.s32 0, %v1570_v10  ;;  %v1576_v12 = vsub.s32 1, %v1570_v10 }
  0x54   :  { %193 = vmatpush1.bf16.msra.mxu0 %v1284_v13 }
  0x55   :  { %194 = vmatprep.subr.bf16.mxu0 %v1388_v0 }
  0x58   :  { %195 = vmatpush1.bf16.msra.mxu0 %v176_v16 }
  0x59   :  { %1211 = vmatprep.subr.bf16.mxu0 %v1390_v21 }
  0x5b   :  { %211 = vmatmul.mubr.bf16.vlgmr.msra.gmra.mrb[0].mxu0 %v97_v17 }
  0x5c   :  { %1213 = vmatpush3.bf16.msra.mxu0 %v1212_v20  ;;  %1122 = vmatprep.mubr.msk.f32.mxu0 %vm1392_vm6, %v1393_v28 }
  0x5d   :  { %1214 = vmatprep.subr.bf16.mxu0 %v1390_v21 }
  0x60   :  { %1216 = vmatpush3.bf16.msra.mxu0 %v1215_v24  ;;  %v1222_v24 = vpack.c.bf16 %v76_v23, %v75_v22  ;;  %v795_v22 = vld [vmem:[#allocation4] sm:$0xff]  ;;  %v796_v23 = vld [vmem:[#allocation4 + $0x8] sm:$0xff] }
  0x61   :  { %1217 = vmatprep.subr.bf16.mxu0 %v1390_v21 }
  0x64   :  { %1220 = vmatpush3.bf16.msk.msra.mxu0 %vm1219_vm5, %v1218_v27  ;;  %v1225_v27 = vpack.c.bf16 %v78_v26, %v77_v25  ;;  %v1235_v25 = vpack.c.bf16 %v796_v23, %v795_v22  ;;  %v798_v26 = vld [vmem:[#allocation4 + $0x18] sm:$0xff] }
  0x65   :  { %1164 = vmatprep.subr.bf16.mxu0 %v1393_v28 }
 0x12e   :  { %v1535_v29 = vpop.f32.mrb[0].mxu0 }
 0x12f   :  { %v219_v30 = vsel %vm218_vm7, %v1535_v29, 0.0  ;;  %v226_v31 = vmul.f32 %v1535_v29, %v1535_v29  ;;  %v214_v32 = vpop.f32.mrb[1].mxu0 }
 0x130   :  { %v220_v33 = vrot.slane %v219_v30, 4  ;;  %v215_v34 = vpop.f32.mrb[2].mxu0  ;;  %v81_v32 = vld [vmem:[#allocation6 + $0x68] sm:$0xff] }
 0x131   :  { %v227_v35 = vsel %vm218_vm7, %v226_v31, 0.0  ;;  %v216_v36 = vpop.f32.mrb[3].mxu0 }
 0x132   :  { %v221_v37 = vadd.f32 %v220_v33, %v219_v30  ;;  %v228_v38 = vrot.slane %v227_v35, 4  ;;  %v80_v30 = vld [vmem:[#allocation6 + $0x60] sm:$0xff]  ;;  %v82_v33 = vld [vmem:[#allocation6 + $0x70] sm:$0xff] }
 0x133   :  { %v1231_v34 = vpack.c.bf16 %v82_v33, %v81_v32  ;;  %v801_v32 = vld [vmem:[#allocation4 + $0x30] sm:$0xff] }
 0x134   :  { %v222_v39 = vrot.slane %v221_v37, 2  ;;  %v229_v40 = vadd.f32 %v228_v38, %v227_v35 }
 0x136   :  { %v223_v41 = vadd.f32 %v222_v39, %v221_v37  ;;  %v230_v42 = vrot.slane %v229_v40, 2 }
 0x138   :  { %v224_v43 = vrot.slane %v223_v41, 1  ;;  %v231_v44 = vadd.f32 %v230_v42, %v229_v40 }
 0x13a   :  { %v232_v45 = vrot.slane %v231_v44, 1  ;;  %v225_v46 = vadd.f32 %v224_v43, %v223_v41 }
 0x13c   :  { %v233_v47 = vadd.f32 %v232_v45, %v231_v44 }
 0x13e   :  { %v235_v48 = vsel %vm234_vm8, %v225_v46, %v233_v47 }
 0x13f   :  { %1123 = vmatmul.mubr.msk.f32.vlgmr.msra.gmra.mrb[4].mxu0 %vm236_vm9, %v235_v48 }
 0x140   :  { %1172 = vmatprep.mubr.msk.bf16.mxu0 %vm1392_vm6, %v1393_v28 }
 0x212   :  { %v310_v50 = vpop.f32.mrb[4].mxu0 }
 0x213   :  { %v314_v51 = vmul.f32 0.033333335, %v310_v50  ;;  %v1124_v52 = vpop.f32.mrb[5].mxu0 }
 0x215   :  { %v315_v53 = vmul.f32 %v314_v51, %v314_v51 }
 0x217   :  { %v317_v54 = vrot.slane %v315_v53, 7 }
 0x219   :  { %v319_v55 = vsub.f32 %v314_v51, %v317_v54 }
 0x21b   :  { %v320_v56 = vmax.f32 %v319_v55, 0.0 }
 0x21d   :  { %v321_v57 = vadd.f32 1e-05, %v320_v56 }
 0x21f   :  { %1293 = vrsqrt.f32 %v321_v57 }
 0x229   :  { %v1294_v58 = vpop.eup %1293 }
 0x22a   :  { %v324_v60 = vrot.slane %v1294_v58, 1 }
 0x22c   :  { %v326_v61 = vmul.f32 %v324_v60, %v1549_v59 }
 0x22e   :  { %v327_v62 = vmul.f32 %v326_v61, %v314_v51 }
 0x230   :  { %v329_v63 = vrot.slane %v327_v62, 7 }
 0x232   :  { %v331_v1 = vsub.f32 %v1549_v59, %v329_v63 }
 0x234   :  { %v332_v2 = vsel %vm234_vm8, %v326_v61, %v331_v1 }
 0x235   :  { %1128 = vmatmul.mubr.msk.f32.vlgmr.msra.gmra.mrb[0].mxu1 %vm333_vm10, %v332_v2 }
 0x236   :  { %1136 = vmatprep.mubr.msk.bf16.mxu1 %vm1392_vm6, %v1393_v28  ;;  %1131 = vmatpush3.bf16.msra.mxu1 %v1286_v3 }
 0x237   :  { %1132 = vmatprep.subr.bf16.mxu1 %v1393_v28 }
 0x23a   :  { %1133 = vmatpush3.bf16.msra.mxu1 %v1287_v5  ;;  %v83_v5 = vld [vmem:[#allocation6 + $0x78] sm:$0xff] }
 0x23b   :  { %1134 = vmatprep.subr.bf16.mxu1 %v1393_v28 }
 0x23e   :  { %1135 = vmatpush3.bf16.msra.mxu1 %v453_v8 }
 0x23f   :  { %1221 = vmatprep.subr.bf16.mxu1 %v1390_v21 }
 0x308   :  { %v406_v13 = vpop.f32.mrb[0].mxu1 }
 0x309   :  { %v413_v14 = vrot.slane %v406_v13, %v1573_v11  ;;  %v1129_v15 = vpop.f32.mrb[1].mxu1  ;;  %v418_v17 = vrot.slane %v406_v13, %v1576_v12 }
 0x30b   :  { %v414_v16 = vmul.f32 %v413_v14, %v1535_v29  ;;  %v79_v29 = vld [vmem:[#allocation6 + $0x58] sm:$0xff] }
 0x30c   :  { %v1228_v31 = vpack.c.bf16 %v80_v30, %v79_v29  ;;  %v799_v29 = vld [vmem:[#allocation4 + $0x20] sm:$0xff]  ;;  %v800_v30 = vld [vmem:[#allocation4 + $0x28] sm:$0xff] }
 0x30d   :  { %v419_v18 = vadd.f32 %v418_v17, %v414_v16  ;;  %v1289_v16 = vld [vmem:[#allocation2] sm:$0xff]   ;;  %v1290_v17 = vld [vmem:[#allocation2 + $0x8] sm:$0xff]  }
 0x30e   :  { %1165 = vmatpush3.bf16.msra.mxu0 %v1289_v16 }
 0x30f   :  { %1295 = vtanh.f32 %v419_v18  ;;  %1166 = vmatprep.subr.bf16.mxu0 %v1393_v28  ;;  %v1291_v18 = vld [vmem:[#allocation2 + $0x10] sm:$0xff]  }
 0x312   :  { %1167 = vmatpush3.bf16.msra.mxu0 %v1290_v17 }
 0x313   :  { %1168 = vmatprep.subr.bf16.mxu0 %v1393_v28 }
 0x316   :  { %1169 = vmatpush3.bf16.msra.mxu0 %v1291_v18 }
 0x317   :  { %1170 = vmatprep.subr.bf16.mxu0 %v1393_v28 }
 0x319   :  { %v1296_v19 = vpop.eup %1295 }
 0x31a   :  { %v421_v20 = vpack.c.bf16 %v1296_v19, %v1296_v19  ;;  %v1292_v19 = vld [vmem:[#allocation2 + $0x18] sm:$0x3f]  }
 0x31c   :  { %1137 = vmatmul.mubr.msk.bf16.vlgmr.msra.gmra.mrb[4].mxu1 %vm236_vm9, %v421_v20  ;;  %v742_v20 = vsel %vm448_vm11, %v1292_v19, 0 }
 0x31d   :  { %1156 = vmatprep.mubr.msk.f32.mxu1 %vm1392_vm6, %v1393_v28  ;;  %1223 = vmatpush3.bf16.msra.mxu1 %v1222_v24  ;;  %v797_v24 = vld [vmem:[#allocation4 + $0x10] sm:$0xff] }
 0x31e   :  { %1224 = vmatprep.subr.bf16.mxu1 %v1390_v21  ;;  %1171 = vmatpush3.bf16.msra.mxu0 %v742_v20 }
 0x321   :  { %1226 = vmatpush3.bf16.msra.mxu1 %v1225_v27  ;;  %v1238_v27 = vpack.c.bf16 %v798_v26, %v797_v24  ;;  %v934_v26 = vrot.slane %v1549_v59, %v1576_v12 }
 0x322   :  { %1227 = vmatprep.subr.bf16.mxu1 %v1390_v21 }
 0x325   :  { %1229 = vmatpush3.bf16.msra.mxu1 %v1228_v31  ;;  %v1241_v31 = vpack.c.bf16 %v800_v30, %v799_v29 }
 0x326   :  { %1230 = vmatprep.subr.bf16.mxu1 %v1390_v21 }
 0x329   :  { %1233 = vmatpush3.bf16.msk.msra.mxu1 %vm1232_vm13, %v1231_v34  ;;  %v803_v34 = vld [vmem:[#allocation4 + $0x40] sm:$0xff]  ;;  %vm1010_vm13 = vcmask 64512  }
 0x32a   :  { %1159 = vmatprep.subr.mxu1 %v1393_v28 }
 0x3ef   :  { %v1590_v35 = vpop.f32.mrb[4].mxu1 }
 0x3f0   :  { %v496_v36 = vsel %vm495_vm14, %v1590_v35, 0.0  ;;  %v503_v37 = vmul.f32 %v1590_v35, %v1590_v35  ;;  %v1138_v38 = vpop.f32.mrb[5].mxu1 }
 0x3f1   :  { %v497_v39 = vrot.slane %v496_v36, 4  ;;  %v492_v40 = vpop.f32.mrb[6].mxu1  ;;  %v805_v38 = vld [vmem:[#allocation4 + $0x50] sm:$0xff] }
 0x3f2   :  { %v504_v41 = vsel %vm495_vm14, %v503_v37, 0.0  ;;  %v1139_v42 = vpop.f32.mrb[7].mxu1  ;;  %vm1012_vm14 = vcmask 97280  }
 0x3f3   :  { %v498_v43 = vadd.f32 %v497_v39, %v496_v36  ;;  %v505_v44 = vrot.slane %v504_v41, 4  ;;  %v804_v36 = vld [vmem:[#allocation4 + $0x48] sm:$0xff]  ;;  %v806_v39 = vld [vmem:[#allocation4 + $0x58] sm:$0xff] }
 0x3f4   :  { %v1247_v37 = vpack.c.bf16 %v804_v36, %v803_v34  ;;  %v1250_v40 = vpack.c.bf16 %v806_v39, %v805_v38 }
 0x3f5   :  { %v499_v45 = vrot.slane %v498_v43, 2  ;;  %v506_v46 = vadd.f32 %v505_v44, %v504_v41 }
 0x3f7   :  { %v500_v47 = vadd.f32 %v499_v45, %v498_v43  ;;  %v507_v48 = vrot.slane %v506_v46, 2 }
 0x3f9   :  { %v501_v49 = vrot.slane %v500_v47, 1  ;;  %v508_v50 = vadd.f32 %v507_v48, %v506_v46 }
 0x3fb   :  { %v509_v51 = vrot.slane %v508_v50, 1  ;;  %v502_v52 = vadd.f32 %v501_v49, %v500_v47  ;;  %v807_v49 = vld [vmem:[#allocation4 + $0x60] sm:$0xff] }
 0x3fd   :  { %v510_v53 = vadd.f32 %v509_v51, %v508_v50  ;;  %v808_v50 = vld [vmem:[#allocation4 + $0x68] sm:$0xff] }
 0x3fe   :  { %v1253_v51 = vpack.c.bf16 %v808_v50, %v807_v49 }
 0x3ff   :  { %v511_v54 = vsel %vm234_vm8, %v502_v52, %v510_v53  ;;  %v809_v52 = vld [vmem:[#allocation4 + $0x70] sm:$0xff]  ;;  %v810_v53 = vld [vmem:[#allocation4 + $0x78] sm:$0xff] }
 0x400   :  { %1157 = vmatmul.mubr.msk.f32.vlgmr.msra.gmra.mrb[2].mxu1 %vm512_vm15, %v511_v54  ;;  %v787_v54 = vsub.s32 2, %v1570_v10 }
 0x401   :  { %1161 = vmatprep.mubr.msk.f32.mxu1 %vm1392_vm6, %v1393_v28  ;;  %1160 = vmatpush3.msk.msra.mxu1 %vm172_vm2, %v83_v5  ;;  %vm793_vm2 = vcmask 1041408  }
 0x402   :  { %1234 = vmatprep.subr.bf16.mxu1 %v1390_v21 }
 0x4d3   :  { %v585_v55 = vpop.f32.mrb[2].mxu1 }
 0x4d4   :  { %v589_v56 = vmul.f32 0.033333335, %v585_v55  ;;  %v1158_v57 = vpop.f32.mrb[3].mxu1  ;;  %v788_v55 = vrot.slane %v1549_v59, %v787_v54 }
 0x4d6   :  { %v590_v58 = vmul.f32 %v589_v56, %v589_v56 }
 0x4d8   :  { %v592_v60 = vrot.slane %v590_v58, 7 }
 0x4da   :  { %v594_v61 = vsub.f32 %v589_v56, %v592_v60 }
 0x4dc   :  { %v595_v62 = vmax.f32 %v594_v61, 0.0 }
 0x4de   :  { %v596_v63 = vadd.f32 1e-05, %v595_v62 }
 0x4e0   :  { %1297 = vrsqrt.f32 %v596_v63 }
 0x4ea   :  { %v1298_v1 = vpop.eup %1297 }
 0x4eb   :  { %v599_v2 = vrot.slane %v1298_v1, 1 }
 0x4ed   :  { %600 = vrot.lane.b32.xlu0 %v599_v2, %s1383_s12 }
 0x55f   :  { %v601_v3 = vpop.permute.xlu0 %600 }
 0x560   :  { %v603_v4 = vmul.f32 %v601_v3, %v1549_v59 }
 0x562   :  { %605 = vrot.lane.b32.xlu0 %v603_v4, %s1394_s2 }
 0x5d4   :  { %v606_v6 = vpop.permute.xlu0 %605 }
 0x5d5   :  { %v608_v7 = vmul.f32 %v606_v6, %v589_v56 }
 0x5d7   :  { %v610_v8 = vrot.slane %v608_v7, 7 }
 0x5d9   :  { %611 = vrot.lane.b32.xlu1 %v610_v8, %s1383_s12  ;;  %s1395_s12 = smov 88  }
 0x64b   :  { %v612_v9 = vpop.permute.xlu1 %611 }
 0x64c   :  { %v614_v13 = vsub.f32 %v1549_v59, %v612_v9 }
 0x64e   :  { %v615_v14 = vsel %vm234_vm8, %v603_v4, %v614_v13 }
 0x64f   :  { %617 = vrot.lane.b32.xlu1 %v615_v14, %s1394_s2 }
 0x6c1   :  { %v618_v15 = vpop.permute.xlu1 %617 }
 0x6c2   :  { %1162 = vmatmul.mubr.msk.f32.vlgmr.msra.gmra.mrb[8].mxu1 %vm619_vm0, %v618_v15 }
 0x6c3   :  { %1208 = vmatprep.mubr.msk.f32.mxu1 %vm1392_vm6, %v1393_v28  ;;  %1236 = vmatpush3.bf16.msra.mxu1 %v1235_v25  ;;  %v802_v28 = vld [vmem:[#allocation4 + $0x38] sm:$0xff] }
 0x6c4   :  { %1237 = vmatprep.subr.bf16.mxu1 %v1390_v21  ;;  %v1244_v33 = vpack.c.bf16 %v802_v28, %v801_v32 }
 0x6c7   :  { %1239 = vmatpush3.bf16.msra.mxu1 %v1238_v27 }
 0x6c8   :  { %1240 = vmatprep.subr.bf16.mxu1 %v1390_v21 }
 0x6cb   :  { %1242 = vmatpush3.bf16.msra.mxu1 %v1241_v31 }
 0x6cc   :  { %1243 = vmatprep.subr.bf16.mxu1 %v1390_v21 }
 0x6cf   :  { %1245 = vmatpush3.bf16.msra.mxu1 %v1244_v33 }
 0x6d0   :  { %1246 = vmatprep.subr.bf16.mxu1 %v1390_v21 }
 0x6d3   :  { %1248 = vmatpush3.bf16.msra.mxu1 %v1247_v37 }
 0x6d4   :  { %1249 = vmatprep.subr.bf16.mxu1 %v1390_v21 }
 0x6d7   :  { %1251 = vmatpush3.bf16.msra.mxu1 %v1250_v40 }
 0x6d8   :  { %1252 = vmatprep.subr.bf16.mxu1 %v1390_v21 }
 0x6db   :  { %1254 = vmatpush3.bf16.msra.mxu1 %v1253_v51 }
 0x6dc   :  { %1255 = vmatprep.subr.bf16.mxu1 %v1390_v21 }
 0x795   :  { %v691_v41 = vpop.f32.mrb[8].mxu1 }
 0x796   :  { %v698_v42 = vrot.slane %v691_v41, %v1573_v11  ;;  %v1163_v43 = vpop.f32.mrb[9].mxu1  ;;  %v703_v45 = vrot.slane %v691_v41, %v1576_v12 }
 0x798   :  { %v699_v44 = vmul.f32 %v698_v42, %v1590_v35  ;;  %v1256_v35 = vpack.c.bf16 %v810_v53, %v809_v52 }
 0x79a   :  { %v704_v46 = vadd.f32 %v703_v45, %v699_v44  ;;  %1257 = vmatpush3.bf16.msra.mxu1 %v1256_v35 }
 0x79c   :  { %1299 = vtanh.f32 %v704_v46 }
 0x7a6   :  { %v1622_v47 = vpop.eup %1299 }
 0x7a7   :  { %v706_v48 = vpack.c.bf16 %v1622_v47, %v1622_v47 }
 0x7a9   :  { %1173 = vmatmul.mubr.msk.bf16.vlgmr.msra.gmra.mrb[8].mxu0 %vm512_vm15, %v706_v48 }
 0x87c   :  { %v1630_v56 = vpop.f32.mrb[8].mxu0 }
 0x87d   :  { %v784_v57 = vmul.f32 %v1630_v56, %v1630_v56  ;;  %v895_v58 = vsel %vm894_vm1, %v1630_v56, 0.0  ;;  %v1174_v60 = vpop.f32.mrb[9].mxu0 }
 0x87e   :  { %v896_v61 = vrot.slane %v895_v58, 4  ;;  %v781_v62 = vpop.f32.mrb[10].mxu0 }
 0x87f   :  { %v903_v21 = vsel %vm894_vm1, %v784_v57, 0.0  ;;  %v1175_v63 = vpop.f32.mrb[11].mxu0  ;;  %v789_v1 = vmul.f32 %v788_v55, %v784_v57  ;;  %vm1014_vm1 = vcmask 130048  }
 0x880   :  { %v897_v2 = vadd.f32 %v896_v61, %v895_v58  ;;  %v904_v3 = vrot.slane %v903_v21, 4 }
 0x881   :  { %v791_v10 = vrot.slane %v789_v1, 6 }
 0x882   :  { %v898_v4 = vrot.slane %v897_v2, 2  ;;  %v905_v5 = vadd.f32 %v904_v3, %v903_v21 }
 0x883   :  { %v794_v6 = vsel %vm793_vm2, %v784_v57, %v791_v10 }
 0x884   :  { %v899_v7 = vadd.f32 %v898_v4, %v897_v2  ;;  %v906_v8 = vrot.slane %v905_v5, 2  ;;  %1209 = vmatmul.mubr.f32.vlgmr.msra.gmra.mrb[10].mxu1 %v794_v6 }
 0x886   :  { %v900_v9 = vrot.slane %v899_v7, 1  ;;  %v907_v13 = vadd.f32 %v906_v8, %v905_v5 }
 0x888   :  { %v901_v14 = vadd.f32 %v900_v9, %v899_v7  ;;  %v908_v15 = vrot.slane %v907_v13, 1 }
 0x88a   :  { %v902_v16 = vmul.f32 0.5, %v901_v14  ;;  %v909_v17 = vadd.f32 %v908_v15, %v907_v13 }
 0x88c   :  { %v910_v18 = vmul.f32 0.5, %v909_v17  ;;  %v911_v19 = vmul.f32 %v902_v16, %v902_v16  ;;  %v914_v20 = vsub.f32 %v1630_v56, %v902_v16 }
 0x88e   :  { %v912_v22 = vsub.f32 %v910_v18, %v911_v19 }
 0x890   :  { %v913_v23 = vmax.f32 %v912_v22, 0.0  ;;  %v1008_v22 = vsel %vm512_vm15, %v1622_v47, 0.0 }
 0x892   :  { %v915_v24 = vadd.f32 1e-05, %v913_v23 }
 0x894   :  { %1301 = vrsqrt.f32 %v915_v24 }
 0x89e   :  { %v1302_v25 = vpop.eup %1301 }
 0x89f   :  { %918 = vrot.lane.b32.xlu0 %v1302_v25, %s1395_s12 }
 0x8a3   :  { %936 = vrot.lane.b32.xlu0 %v934_v26, %s1396_s19 }
 0x911   :  { %v919_v27 = vpop.permute.xlu0 %918 }
 0x912   :  { %v921_v29 = vmul.f32 %v919_v27, %v1549_v59 }
 0x914   :  { %v925_v30 = vrot.slane %v921_v29, %v1573_v11 }
 0x915   :  { %v937_v33 = vpop.permute.xlu0 %936 }
 0x916   :  { %927 = vrot.lane.b32.xlu1 %v925_v30, %s1396_s19 }
 0x957   :  { %v1640_v31 = vpop.f32.mrb[10].mxu1 }
 0x958   :  { %v1210_v32 = vpop.f32.mrb[11].mxu1  ;;  %vm889_vm6 = vcmp.eq.f32.partialorder %v1640_v31, inf  ;;  %v892_v21 = vand.u32 2147483648, %v1640_v31  ;;  %vm891_vm8 = vcmp.eq.f32.partialorder %v1640_v31, 0.0 }
 0x988   :  { %v928_v28 = vpop.permute.xlu1 %927 }
 0x989   :  { %v930_v34 = vmul.f32 %v928_v28, %v914_v20 }
 0x98b   :  { %v939_v36 = vadd.f32 %v937_v33, %v930_v34 }
 0x98d   :  { %941 = vrot.lane.b32.xlu1 %v939_v36, %s1386_s25  ;;  %vm969_vm3 = vcmp.ge.f32.partialorder %v939_v36, 0.0  ;;  %vm968_vm7 = vcmp.lt.f32.partialorder %v939_v36, 0.0 }
 0x98e   :  { %v970_v12 = vsel %vm969_vm3, 1, %v1388_v0  ;;  %v985_v1 = vsel %vm968_vm7, 1, %v1388_v0  ;;  %v881_v0 = vadd.f32 1e-12, %v1640_v31 }
 0x98f   :  { %971 = vrot.lane.b32.xlu0 %v970_v12, %s1397_s20 }
 0x9ff   :  { %v942_v37 = vpop.permute.xlu1 %941 }
 0xa00   :  { %1303 = vrcp.f32 %v942_v37 }
 0xa01   :  { %v972_v2 = vpop.permute.xlu0 %971 }
 0xa02   :  { %vm973_vm9 = vcmp.ne.s32.totalorder %v972_v2, 0 }
 0xa03   :  { %vm974_vm10 = vmand %vm968_vm7, %vm973_vm9 }
 0xa0a   :  { %v1304_v59 = vpop.eup %1303 }
 0xa0b   :  { %v945_v11 = vmul.f32 %v1304_v59, %v939_v36 }
 0xa0d   :  { %v946_v38 = vand.u32 2147483647, %v945_v11  ;;  %vm965_vm5 = vcmp.lt.f32.partialorder %v945_v11, 0.0 }
 0xa0f   :  { %1305 = vrcp.f32 %v946_v38  ;;  %vm947_vm4 = vcmp.gt.f32.partialorder %v946_v38, 1.0 }
 0xa10   :  { %1307 = vrsqrt.f32 %v1640_v31 }
 0xa11   :  { %1309 = vrcp.f32 %v881_v0 }
 0xa19   :  { %v1306_v39 = vpop.eup %1305 }
 0xa1a   :  { %v950_v40 = vsel %vm947_vm4, %v1306_v39, %v946_v38  ;;  %v1308_v35 = vpop.eup %1307 }
 0xa1b   :  { %v951_v41 = vmul.f32 %v950_v40, %v950_v40  ;;  %v888_v57 = vmul.f32 %v1308_v35, %v1640_v31 }
 0xa1d   :  { %v952_v42 = vmul.f32 -0.0117212, %v951_v41  ;;  %v890_v62 = vsel %vm889_vm6, %v1640_v31, %v888_v57 }
 0xa1e   :  { %v893_v63 = vsel %vm891_vm8, %v892_v21, %v890_v62 }
 0xa1f   :  { %v953_v43 = vadd.f32 0.05265332, %v952_v42 }
 0xa21   :  { %v954_v44 = vmul.f32 %v953_v43, %v951_v41 }
 0xa23   :  { %v955_v45 = vadd.f32 -0.11643287, %v954_v44 }
 0xa25   :  { %v956_v46 = vmul.f32 %v955_v45, %v951_v41 }
 0xa27   :  { %v957_v48 = vadd.f32 0.19354346, %v956_v46 }
 0xa29   :  { %v958_v49 = vmul.f32 %v957_v48, %v951_v41 }
 0xa2b   :  { %v959_v50 = vadd.f32 -0.33262348, %v958_v49 }
 0xa2d   :  { %v960_v51 = vmul.f32 %v959_v50, %v951_v41 }
 0xa2f   :  { %v961_v52 = vadd.f32 0.99997723, %v960_v51 }
 0xa31   :  { %v962_v53 = vmul.f32 %v961_v52, %v950_v40 }
 0xa33   :  { %v963_v54 = vsub.f32 1.5707964, %v962_v53 }
 0xa35   :  { %v964_v55 = vsel %vm947_vm4, %v963_v54, %v962_v53 }
 0xa36   :  { %v966_v58 = vsub.f32 0.0, %v964_v55 }
 0xa38   :  { %v967_v60 = vsel %vm965_vm5, %v966_v58, %v964_v55 }
 0xa39   :  { %v975_v61 = vadd.f32 3.1415927, %v967_v60  ;;  %981 = vrot.lane.b32.xlu0 %v967_v60, %s1397_s20 }
 0xa3b   :  { %977 = vrot.lane.b32.xlu1 %v975_v61, %s1397_s20 }
 0xa3d   :  { %997 = vrot.lane.b32.xlu0 %v893_v63, %s1386_s25  ;;  %s1399_s25 = smov 84  }
 0xa3f   :  { %986 = vrot.lane.b32.xlu1 %v985_v1, %s1397_s20 }
 0xa43   :  { %1001 = vrot.lane.b32.xlu1 %v1630_v56, %s1398_s21  ;;  %v1310_v56 = vpop.eup %1309 }
 0xa44   :  { %v884_v9 = vrot.slane %v1310_v56, 6 }
 0xa46   :  { %v886_v13 = vmul.f32 %v884_v9, %v1640_v31 }
 0xa48   :  { %v994_v15 = vrot.slane %v886_v13, 2 }
 0xaab   :  { %v982_v10 = vpop.permute.xlu0 %981 }
 0xaad   :  { %v978_v3 = vpop.permute.xlu1 %977 }
 0xaae   :  { %v984_v4 = vsel %vm974_vm10, %v978_v3, %v982_v10 }
 0xaaf   :  { %v1062_v6 = vadd.f32 -3.1415927, %v984_v4  ;;  %v998_v14 = vpop.permute.xlu0 %997 }
 0xab0   :  { %v1009_v17 = vsel %vm619_vm0, %v994_v15, %v998_v14 }
 0xab1   :  { %v987_v5 = vpop.permute.xlu1 %986 }
 0xab2   :  { %vm988_vm11 = vcmp.ne.s32.totalorder %v987_v5, 0 }
 0xab3   :  { %vm989_vm12 = vmand %vm968_vm7, %vm988_vm11 }
 0xab4   :  { %v991_v7 = vsel %vm989_vm12, %v1062_v6, %v984_v4 }
 0xab5   :  { %v992_v8 = vmul.f32 0.15915494, %v991_v7  ;;  %v1002_v16 = vpop.permute.xlu1 %1001 }
 0xab6   :  { %v1011_v18 = vsel %vm1010_vm13, %v1009_v17, %v1002_v16 }
 0xab7   :  { %1005 = vrot.lane.b32.xlu0 %v992_v8, %s1399_s25 }
 0xb29   :  { %v1006_v19 = vpop.permute.xlu0 %1005 }
 0xb2a   :  { %v1013_v20 = vsel %vm1012_vm14, %v1011_v18, %v1006_v19 }
 0xb2b   :  { %v1015_v23 = vsel %vm1014_vm1, %v1013_v20, 0.0 }
 0xb2c   :  { %v1018_v24 = vcombine.low %v1008_v22, %v1015_v23 }
 0xb2e   :  { %1063 = vst.sshfl [vmem:[%s1677_s7] sm:$0x33 pattern:$0x76325410] %v1018_v24 }
 0xb2f   :  { %1032 = vsyncpa [#allocation3], 1 }
 0xb30   :  { %1033 = vsyncpa [#allocation5], 1 }

</bundles_post_ra>
